<compile_context>
chip_gen: v7x
topology: tpu7x:2x2x1
jax: 0.10.0
libtpu: 0.0.40
codegen_flags: <defaults>
</compile_context>

<pallas_src>
import numpy as np
import jax
import jax.numpy as jnp
from jax.experimental import pallas as pl
from jax.experimental.pallas import tpu as pltpu


# --------------------------------------------------------------------------- #
# Pallas kernel: y = relu(x @ W0t_eff + b0_eff) @ W1t_eff + b1_eff
#   x        : [tm, EMB]   f32 (cast to bf16 in-kernel)
#   W0t_eff  : [EMB, EXP]  compute dtype (pre-scaled, pre-transposed)
#   b0_eff   : [1, EXP]    f32
#   W1t_eff  : [EXP, EMB]  compute dtype (pre-scaled, pre-transposed)
#   b1_eff   : [1, EMB]    f32
#   out      : [tm, EMB]   x.dtype
# --------------------------------------------------------------------------- #
def _mixed_ff_kernel(x_ref, w0t_ref, b0_ref, w1t_ref, b1_ref, o_ref):
    # In-kernel cast of the activation tile: free VPU work under the MXU, avoids a
    # separate wrapper cast pass (and its extra HBM read/write) over x.
    x = x_ref[...].astype(w0t_ref.dtype)
    # First mixed linear: MXU with low-precision inputs, f32 accumulation.
    h = jnp.dot(x, w0t_ref[...], preferred_element_type=jnp.float32)
    # Bias + ReLU in f32 on the VPU (v5e-safe).
    h = jnp.maximum(h + b0_ref[...], 0.0)
    # Second mixed linear.
    y = jnp.dot(h.astype(w1t_ref.dtype), w1t_ref[...],
                preferred_element_type=jnp.float32)
    o_ref[...] = (y + b1_ref[...]).astype(o_ref.dtype)


def _choose_tm(T, tm_req):
    """Token tile: multiple of 8, capped at T; prefer >= 2 grid steps when tokens
    allow it so the 'parallel' axis can shard across both v7x TensorCores."""
    tm = max(8, (min(tm_req, T) // 8) * 8)
    if pl.cdiv(T, tm) < 2 and T >= 256:
        tm = ((pl.cdiv(T, 2) + 7) // 8) * 8
    return tm


def mixed_ff_pallas(x, w0_eff, b0_eff, w1_eff, b1_eff, *,
                    tm=512, compute_dtype=jnp.bfloat16):
    """x: [B, N, EMB] -> [B, N, EMB].

    w0_eff/b0_eff/w1_eff/b1_eff are the mixture-folded super-weights
    (W ⊙ S, b ⊙ m) in PyTorch nn.Linear layout [out, in] / [out].
    """
    B, N, EMB = x.shape
    EXP = w0_eff.shape[0]
    T = B * N

    tm = _choose_tm(T, tm)
    n_tiles = pl.cdiv(T, tm)
    T_pad = n_tiles * tm

    xt = x.reshape(T, EMB)
    if T_pad != T:
        # Only copy x when the tile does not divide T; padded rows produce garbage
        # (relu(b0) @ W1 + b1) and are sliced off below.
        xt = jnp.pad(xt, ((0, T_pad - T), (0, 0)))

    # One-time, tiny wrapper prep: transpose to [in, out] (no in-kernel .T) and cast
    # the (already mixture-folded) weights to the MXU input dtype.
    w0t = jnp.transpose(w0_eff).astype(compute_dtype)   # [EMB, EXP]
    w1t = jnp.transpose(w1_eff).astype(compute_dtype)   # [EXP, EMB]
    b0r = b0_eff.astype(jnp.float32).reshape(1, EXP)
    b1r = b1_eff.astype(jnp.float32).reshape(1, EMB)

    isz_x = jnp.dtype(x.dtype).itemsize
    isz_w = jnp.dtype(compute_dtype).itemsize
    cost = pl.CostEstimate(
        flops=4 * T_pad * EMB * EXP,                       # two GEMMs of EMBxEXP each
        transcendentals=0,
        bytes_accessed=(T_pad * EMB * isz_x                # x read
                        + T_pad * EMB * isz_x              # out written
                        + 2 * EMB * EXP * isz_w            # weights
                        + (EXP + EMB) * 4))                # biases

    out = pl.pallas_call(
        _mixed_ff_kernel,
        out_shape=jax.ShapeDtypeStruct((T_pad, EMB), x.dtype),
        grid_spec=pltpu.PrefetchScalarGridSpec(
            num_scalar_prefetch=0,
            grid=(n_tiles,),
            in_specs=[
                pl.BlockSpec((tm, EMB), lambda i: (i, 0)),    # x tile (f32 in HBM)
                # Constant-index operands: Pallas skips the re-DMA when the block
                # index doesn't change, so these are fetched into VMEM once.
                pl.BlockSpec((EMB, EXP), lambda i: (0, 0)),   # W0t_eff
                pl.BlockSpec((1, EXP), lambda i: (0, 0)),     # b0_eff
                pl.BlockSpec((EXP, EMB), lambda i: (0, 0)),   # W1t_eff
                pl.BlockSpec((1, EMB), lambda i: (0, 0)),     # b1_eff
            ],
            out_specs=pl.BlockSpec((tm, EMB), lambda i: (i, 0)),
        ),
        compiler_params=pltpu.CompilerParams(
            dimension_semantics=("parallel",)),
        cost_estimate=cost,
    )(xt, w0t, b0r, w1t, b1r)

    if T_pad != T:
        out = out[:T]
    return out.reshape(B, N, EMB)


# --------------------------------------------------------------------------- #
# Glue: combination weights -> slice-mask scale matrices (small, plain JAX)
# --------------------------------------------------------------------------- #
def build_mixture_scales(embed_choices, ratio_choices, alpha_embed, alpha_ratio,
                         max_embd, max_exp):
    w_e = jax.nn.softmax(alpha_embed)
    w_r = jax.nn.softmax(alpha_ratio)
    row_idx = jnp.arange(max_exp)
    col_idx = jnp.arange(max_embd)
    s0 = jnp.zeros((max_exp, max_embd), jnp.float32)
    s1 = jnp.zeros((max_embd, max_exp), jnp.float32)
    m0 = jnp.zeros((max_exp,), jnp.float32)
    m1 = jnp.zeros((max_embd,), jnp.float32)
    for ie, e in enumerate(embed_choices):          # itertools.product order
        for ir, r in enumerate(ratio_choices):
            w = w_e[ie] * w_r[ir]
            rmask = (row_idx < e * r).astype(jnp.float32)   # hidden-dim slice
            cmask = (col_idx < e).astype(jnp.float32)       # embed-dim slice
            s0 = s0 + w * rmask[:, None] * cmask[None, :]
            s1 = s1 + w * cmask[:, None] * rmask[None, :]
            m0 = m0 + w * rmask
            m1 = m1 + w * cmask
    return s0, s1, m0, m1, w_e, w_r


# --------------------------------------------------------------------------- #
# Pure-JAX reference (literal loop over MixedLinear candidates, f32)
# --------------------------------------------------------------------------- #
def ref_forward(x, w0, b0, w1, b1, w_e, w_r, embed_choices, ratio_choices):
    EXP, EMB = w0.shape
    h = jnp.zeros(x.shape[:-1] + (EXP,), jnp.float32)
    for ie, e in enumerate(embed_choices):
        for ir, r in enumerate(ratio_choices):
            w = w_e[ie] * w_r[ir]
            o = x[..., :e] @ w0[: e * r, :e].T + b0[: e * r]
            o = jnp.pad(o, [(0, 0), (0, 0), (0, EXP - e * r)])
            h = h + w * o
    h = jnp.maximum(h, 0.0)
    y = jnp.zeros(x.shape[:-1] + (EMB,), jnp.float32)
    for ie, e in enumerate(embed_choices):
        for ir, r in enumerate(ratio_choices):
            w = w_e[ie] * w_r[ir]
            o = h[..., : e * r] @ w1[:e, : e * r].T + b1[:e]
            o = jnp.pad(o, [(0, 0), (0, 0), (0, EMB - e)])
            y = y + w * o
    return y  # dropout: identity in eval mode


# --------------------------------------------------------------------------- #
if __name__ == "__main__":
    # Supernet search-space choices (consistent with the module).
    choices = {"embed_dim": [16, 24, 32], "num_heads": [2, 4], "mlp_ratio": [2, 4]}
    max_embd = max(choices["embed_dim"])           # 32
    max_ratio = max(choices["mlp_ratio"])          # 4
    max_exp = max_embd * max_ratio                 # 128

    B, N = 2, 128                                  # batch, sequence length (T=256 -> 2 tiles)
    key = jax.random.PRNGKey(0)
    k_x, k_w0, k_b0, k_w1, k_b1, k_ae, k_ar = jax.random.split(key, 7)

    # Deterministic super-weights (nn.Linear layout: [out_features, in_features]).
    w0 = jax.random.normal(k_w0, (max_exp, max_embd), jnp.float32) * 0.05
    b0 = jax.random.normal(k_b0, (max_exp,), jnp.float32) * 0.05
    w1 = jax.random.normal(k_w1, (max_embd, max_exp), jnp.float32) * 0.05
    b1 = jax.random.normal(k_b1, (max_embd,), jnp.float32) * 0.05

    # Input tokens and architecture parameters (logits); layer index i = 0.
    x = jax.random.normal(k_x, (B, N, max_embd), jnp.float32)
    arch_params = {
        "embed_dim": jax.random.normal(k_ae, (len(choices["embed_dim"]),), jnp.float32),
        "mlp_ratio": [jax.random.normal(k_ar, (len(choices["mlp_ratio"]),), jnp.float32)],
    }
    i = 0

    # Fold the mixture into the super-weights once (grid-invariant, wrapper side).
    s0, s1, m0, m1, w_e, w_r = build_mixture_scales(
        choices["embed_dim"], choices["mlp_ratio"],
        arch_params["embed_dim"], arch_params["mlp_ratio"][i],
        max_embd, max_exp)
    w0_eff = w0 * s0
    w1_eff = w1 * s1
    b0_eff = b0 * m0
    b1_eff = b1 * m1

    y = mixed_ff_pallas(x, w0_eff, b0_eff, w1_eff, b1_eff,
                        tm=512, compute_dtype=jnp.bfloat16)
    y = jax.block_until_ready(y)

    y_ref = ref_forward(x, w0, b0, w1, b1, w_e, w_r,
                        choices["embed_dim"], choices["mlp_ratio"])
    # bf16 MXU inputs with f32 accumulation: tolerance loosened accordingly.
    np.testing.assert_allclose(np.asarray(y), np.asarray(y_ref), rtol=2e-2, atol=2e-2)

    print("KERNEL_OK")
</pallas_src>

<mosaic_0001>
module attributes {stable_mosaic.version = 11 : i64} {
  func.func @_mixed_ff_kernel(%arg0: i32, %arg1: memref<128x32xf32, #tpu.memory_space<vmem>>, %arg2: memref<32x128xbf16, #tpu.memory_space<vmem>>, %arg3: memref<1x128xf32, #tpu.memory_space<vmem>>, %arg4: memref<128x32xbf16, #tpu.memory_space<vmem>>, %arg5: memref<1x32xf32, #tpu.memory_space<vmem>>, %arg6: memref<128x32xf32, #tpu.memory_space<vmem>>) attributes {dimension_semantics = [#tpu.dimension_semantics<parallel>], iteration_bounds = array<i64: 2>, scalar_prefetch = 0 : i64, scratch_operands = 0 : i64, tpu.core_type = #tpu.core_type<tc>, window_params = [{transform_indices = @transform_0, window_bounds = array<i64: 128, 32>}, {pipeline_mode = #tpu.pipeline_mode<synchronous>, transform_indices = @transform_1, window_bounds = array<i64: 32, 128>}, {pipeline_mode = #tpu.pipeline_mode<synchronous>, transform_indices = @transform_2, window_bounds = array<i64: 1, 128>}, {pipeline_mode = #tpu.pipeline_mode<synchronous>, transform_indices = @transform_3, window_bounds = array<i64: 128, 32>}, {pipeline_mode = #tpu.pipeline_mode<synchronous>, transform_indices = @transform_4, window_bounds = array<i64: 1, 32>}, {transform_indices = @transform_5, window_bounds = array<i64: 128, 32>}]} {
    %c0 = arith.constant 0 : index
    %c0_0 = arith.constant 0 : index
    %0 = vector.load %arg1[%c0, %c0_0] : memref<128x32xf32, #tpu.memory_space<vmem>>, vector<128x32xf32>
    %1 = arith.truncf %0 : vector<128x32xf32> to vector<128x32xbf16>
    %c0_1 = arith.constant 0 : index
    %c0_2 = arith.constant 0 : index
    %2 = vector.load %arg2[%c0_1, %c0_2] : memref<32x128xbf16, #tpu.memory_space<vmem>>, vector<32x128xbf16>
    %cst = arith.constant dense<0.000000e+00> : vector<128x128xf32>
    %3 = tpu.matmul %1, %2, %cst {dimension_numbers = #tpu.dot_dimension_numbers<[1], [0], [0], [1], [0, 0, 1, 1], [], []>} : vector<128x32xbf16>, vector<32x128xbf16>, vector<128x128xf32> -> vector<128x128xf32>
    %c0_3 = arith.constant 0 : index
    %c0_4 = arith.constant 0 : index
    %4 = vector.load %arg3[%c0_3, %c0_4] : memref<1x128xf32, #tpu.memory_space<vmem>>, vector<1x128xf32>
    %5 = vector.broadcast %4 : vector<1x128xf32> to vector<128x128xf32>
    %6 = arith.addf %3, %5 : vector<128x128xf32>
    %cst_5 = arith.constant 0.000000e+00 : f32
    %7 = vector.broadcast %cst_5 : f32 to vector<128x128xf32>
    %8 = arith.maximumf %6, %7 : vector<128x128xf32>
    %9 = arith.truncf %8 : vector<128x128xf32> to vector<128x128xbf16>
    %c0_6 = arith.constant 0 : index
    %c0_7 = arith.constant 0 : index
    %10 = vector.load %arg4[%c0_6, %c0_7] : memref<128x32xbf16, #tpu.memory_space<vmem>>, vector<128x32xbf16>
    %cst_8 = arith.constant dense<0.000000e+00> : vector<128x32xf32>
    %11 = tpu.matmul %9, %10, %cst_8 {dimension_numbers = #tpu.dot_dimension_numbers<[1], [0], [0], [1], [0, 0, 1, 1], [], []>} : vector<128x128xbf16>, vector<128x32xbf16>, vector<128x32xf32> -> vector<128x32xf32>
    %c0_9 = arith.constant 0 : index
    %c0_10 = arith.constant 0 : index
    %12 = vector.load %arg5[%c0_9, %c0_10] : memref<1x32xf32, #tpu.memory_space<vmem>>, vector<1x32xf32>
    %13 = vector.broadcast %12 : vector<1x32xf32> to vector<128x32xf32>
    %14 = arith.addf %11, %13 : vector<128x32xf32>
    %c0_11 = arith.constant 0 : index
    %c0_12 = arith.constant 0 : index
    %15 = vector.load %arg6[%c0_11, %c0_12] : memref<128x32xf32, #tpu.memory_space<vmem>>, vector<128x32xf32>
    tpu.vector_store %arg6[%c0_11, %c0_12], %14 {strides = array<i32>} : memref<128x32xf32, #tpu.memory_space<vmem>>, vector<128x32xf32>,
    return
  }
  func.func @transform_0(%arg0: i32) -> (i32, i32) {
    %c0_i32 = arith.constant 0 : i32
    %c0_i32_0 = arith.constant 0 : i32
    return %arg0, %c0_i32 : i32, i32
  }
  func.func @transform_1(%arg0: i32) -> (i32, i32) {
    %c0_i32 = arith.constant 0 : i32
    %c0_i32_0 = arith.constant 0 : i32
    %c0_i32_1 = arith.constant 0 : i32
    return %c0_i32, %c0_i32_0 : i32, i32
  }
  func.func @transform_2(%arg0: i32) -> (i32, i32) {
    %c0_i32 = arith.constant 0 : i32
    %c0_i32_0 = arith.constant 0 : i32
    %c0_i32_1 = arith.constant 0 : i32
    return %c0_i32, %c0_i32_0 : i32, i32
  }
  func.func @transform_3(%arg0: i32) -> (i32, i32) {
    %c0_i32 = arith.constant 0 : i32
    %c0_i32_0 = arith.constant 0 : i32
    %c0_i32_1 = arith.constant 0 : i32
    return %c0_i32, %c0_i32_0 : i32, i32
  }
  func.func @transform_4(%arg0: i32) -> (i32, i32) {
    %c0_i32 = arith.constant 0 : i32
    %c0_i32_0 = arith.constant 0 : i32
    %c0_i32_1 = arith.constant 0 : i32
    return %c0_i32, %c0_i32_0 : i32, i32
  }
  func.func @transform_5(%arg0: i32) -> (i32, i32) {
    %c0_i32 = arith.constant 0 : i32
    %c0_i32_0 = arith.constant 0 : i32
    return %arg0, %c0_i32 : i32, i32
  }
}

</mosaic_0001>

<bundles_post_ra>
// kernel: tpu_custom_call.1
= control target key start
LH: loop header
LB: loop body
LE: loop exit
PB: predicated region body
PF: predicated region fallthrough
CT: control target
= control target key end

     0   :  { %s843_s18 = smov 0   ;;  %s963_s0 = inlined_call_operand.vmem [shape: f32[256,32], index: 0, kind: input, shape index: {}]   ;;  %s964_s1 = inlined_call_operand.vmem [shape: bf16[32,128], index: 1, kind: input, shape index: {}]   ;;  %s965_s2 = inlined_call_operand.vmem [shape: f32[1,128], index: 2, kind: input, shape index: {}]   ;;  %s966_s3 = inlined_call_operand.vmem [shape: bf16[128,32], index: 3, kind: input, shape index: {}]   ;;  %s967_s4 = inlined_call_operand.vmem [shape: f32[1,32], index: 4, kind: input, shape index: {}]   ;;  %s968_s5 = inlined_call_operand.vmem [shape: f32[256,32], index: 5, kind: output, shape index: {}]  }
   0x1 LB: > { %s662_s19 = sadd.s32 4294967295, %s811_s18   ;;  %p666_p0 = scmp.ge.s32.totalorder %s811_s18, 1  ;;  %s811_s18 = sphi %s843_s18, %s15_s18  }
   0x2   : > { %p188_p1 = scmp.lt.s32.totalorder %s811_s18, 3 }
   0x4   : > { %p189_p2 = pnand %p666_p0, %p188_p1 }
   0x5   : > { %v795_v0 = vld [vmem:[%s964_s1] sm:$0xff] (!%p189_p2)   ;;  %s667_s22 = sshll.u32 (!%p189_p2), %s662_s19, 4  ;;  %v796_v1 = vld [vmem:[%s964_s1 + $0x8] sm:$0xff] (!%p189_p2)   ;;  %v799_v4 = vld [vmem:[%s966_s3 + $0x10] sm:$0xff] (!%p189_p2)   ;;  %vm276_vm0 = vcmask (!%p189_p2), 261120  }
   0x6   : > { %192 = sbr.rel (%p189_p2) target bundleno = 484 (0x1e4), region = 40  ;;  %p217_p3 = scmp.lt.s32.totalorder (!%p189_p2), %s667_s22, 31  ;;  %719 = vmatprep.subr.bf16.mxu0 (!%p189_p2), %v795_v0  ;;  %v797_v2 = vld [vmem:[%s966_s3] sm:$0xff] (!%p189_p2)   ;;  %v798_v3 = vld [vmem:[%s966_s3 + $0x8] sm:$0xff] (!%p189_p2)   ;;  %v800_v16 = vld [vmem:[%s966_s3 + $0x18] sm:$0xff] (!%p189_p2)  }
   0x7   : > { %720 = vmatpush3.bf16.msra.mxu0 (!%p189_p2), %v795_v0  ;;  %771 = vmatprep.subr.bf16.mxu1 (!%p189_p2), %v797_v2  ;;  %v801_v21 = vld [vmem:[%s966_s3 + $0x20] sm:$0xff] (!%p189_p2)   ;;  %v802_v24 = vld [vmem:[%s966_s3 + $0x28] sm:$0xff] (!%p189_p2)   ;;  %v803_v32 = vld [vmem:[%s966_s3 + $0x30] sm:$0xff] (!%p189_p2)  }
   0x8   : > { %721 = vmatprep.subr.bf16.mxu0 (!%p189_p2), %v796_v1  ;;  %779 = vmatpush3.bf16.msra.mxu1 (!%p189_p2), %v797_v2  ;;  %v804_v33 = vld [vmem:[%s966_s3 + $0x38] sm:$0xff] (!%p189_p2)   ;;  %v671_v34 = vld [vmem:[%s965_s2] ss:$0 sm:$0xff] (!%p189_p2) }
   0x9   : > { %772 = vmatprep.subr.bf16.mxu1 (!%p189_p2), %v798_v3 }
   0xb   : > { %722 = vmatpush3.bf16.msra.mxu0 (!%p189_p2), %v796_v1 }
   0xc   : > { %739 = vmatprep.subr.bf16.mxu0 (!%p189_p2), %v797_v2  ;;  %780 = vmatpush3.bf16.msra.mxu1 (!%p189_p2), %v798_v3 }
   0xd   : > { %s970_s22 = smov (!%p217_p3, %s667_s22), 31  ;;  %773 = vmatprep.subr.bf16.mxu1 %v799_v4 }
   0xe   : > { %s668_s29 = sshll.u32 %s970_s22, 3 }
   0xf   : > { %s871_s7 = scalar_lea.vmem %s963_s0, %s668_s29  ;;  %s926_s28 = scalar_lea.vmem %s968_s5, %s668_s29 }
  0x10   : > { %v229_v5 = vld [vmem:[%s871_s7] sm:$0xff]  ;;  %v230_v6 = vld [vmem:[%s871_s7 + $0x8] sm:$0xff]  ;;  %v231_v7 = vld [vmem:[%s871_s7 + $0x10] sm:$0xff]  ;;  %781 = vmatpush3.bf16.msra.mxu1 %v799_v4 }
  0x11   : > { %v245_v8 = vpack.c.bf16 %v230_v6, %v229_v5  ;;  %v232_v9 = vld [vmem:[%s871_s7 + $0x18] sm:$0xff]  ;;  %v233_v10 = vld [vmem:[%s871_s7 + $0x20] sm:$0xff]  ;;  %v234_v11 = vld [vmem:[%s871_s7 + $0x28] sm:$0xff]  ;;  %774 = vmatprep.subr.bf16.mxu1 %v800_v16 }
  0x12   : > { %v246_v12 = vpack.c.bf16 %v232_v9, %v231_v7  ;;  %v247_v13 = vpack.c.bf16 %v234_v11, %v233_v10  ;;  %v235_v14 = vld [vmem:[%s871_s7 + $0x30] sm:$0xff]  ;;  %v236_v15 = vld [vmem:[%s871_s7 + $0x38] sm:$0xff]  ;;  %v237_v17 = vld [vmem:[%s871_s7 + $0x40] sm:$0xff] }
  0x13   : > { %723 = vmatprep.mubr.msk.bf16.mxu0 %vm276_vm0, %v245_v8  ;;  %v238_v18 = vld [vmem:[%s871_s7 + $0x48] sm:$0xff]  ;;  %v248_v19 = vpack.c.bf16 %v236_v15, %v235_v14  ;;  %v239_v22 = vld [vmem:[%s871_s7 + $0x50] sm:$0xff]  ;;  %v240_v23 = vld [vmem:[%s871_s7 + $0x58] sm:$0xff] }
  0x14   : > { %724 = vmatmul.mubr.msk.bf16.vlgmr.msra.gmra.mrb[0].mxu0 %vm276_vm0, %v246_v12  ;;  %v249_v20 = vpack.c.bf16 %v238_v18, %v237_v17  ;;  %782 = vmatpush3.bf16.msra.mxu1 %v800_v16  ;;  %v241_v25 = vld [vmem:[%s871_s7 + $0x60] sm:$0xff]  ;;  %v242_v26 = vld [vmem:[%s871_s7 + $0x68] sm:$0xff]  ;;  %v250_v27 = vpack.c.bf16 %v240_v23, %v239_v22  ;;  %v243_v29 = vld [vmem:[%s871_s7 + $0x70] sm:$0xff] }
  0x15   : > { %727 = vmatprep.mubr.msk.bf16.mxu0 %vm276_vm0, %v247_v13  ;;  %740 = vmatpush3.bf16.msra.mxu0 %v797_v2  ;;  %v251_v28 = vpack.c.bf16 %v242_v26, %v241_v25  ;;  %v244_v30 = vld [vmem:[%s871_s7 + $0x78] sm:$0xff] }
  0x16   : > { %741 = vmatprep.subr.bf16.mxu0 %v798_v3  ;;  %775 = vmatprep.subr.bf16.mxu1 %v801_v21  ;;  %v252_v31 = vpack.c.bf16 %v244_v30, %v243_v29 }
  0x18   : > { %783 = vmatpush3.bf16.msra.mxu1 %v801_v21 }
  0x19   : > { %742 = vmatpush3.bf16.msra.mxu0 %v798_v3  ;;  %776 = vmatprep.subr.bf16.mxu1 %v802_v24 }
  0x1a   : > { %743 = vmatprep.subr.bf16.mxu0 %v799_v4 }
  0x1c   : > { %728 = vmatmul.mubr.msk.bf16.gmra.mrb[4].mxu0 %vm276_vm0, %v248_v19  ;;  %784 = vmatpush3.bf16.msra.mxu1 %v802_v24 }
  0x1d   : > { %731 = vmatprep.mubr.msk.bf16.mxu0 %vm276_vm0, %v249_v20  ;;  %744 = vmatpush3.bf16.msra.mxu0 %v799_v4 }
  0x1e   : > { %745 = vmatprep.subr.bf16.mxu0 %v800_v16  ;;  %777 = vmatprep.subr.bf16.mxu1 %v803_v32 }
  0x20   : > { %785 = vmatpush3.bf16.msra.mxu1 %v803_v32 }
  0x21   : > { %746 = vmatpush3.bf16.msra.mxu0 %v800_v16  ;;  %778 = vmatprep.subr.bf16.mxu1 %v804_v33 }
  0x22   : > { %747 = vmatprep.subr.bf16.mxu0 %v801_v21 }
  0x24   : > { %732 = vmatmul.mubr.msk.bf16.gmra.mrb[8].mxu0 %vm276_vm0, %v250_v27  ;;  %786 = vmatpush3.bf16.msra.mxu1 %v804_v33  ;;  %v682_v27 = vld [vmem:[%s967_s4] ss:$0 sm:$0xff] }
  0x25   : > { %735 = vmatprep.mubr.msk.bf16.mxu0 %vm276_vm0, %v251_v28  ;;  %748 = vmatpush3.bf16.msra.mxu0 %v801_v21 }
  0x26   : > { %749 = vmatprep.subr.bf16.mxu0 %v802_v24 }
  0x29   : > { %750 = vmatpush3.bf16.msra.mxu0 %v802_v24 }
  0x2a   : > { %751 = vmatprep.subr.bf16.mxu0 %v803_v32 }
  0x2c   : > { %736 = vmatmul.mubr.msk.bf16.gmra.mrb[12].mxu0 %vm276_vm0, %v252_v31 }
  0x2d   : > { %752 = vmatpush3.bf16.msra.mxu0 %v803_v32 }
  0x2e   : > { %753 = vmatprep.subr.bf16.mxu0 %v804_v33 }
  0x31   : > { %754 = vmatpush3.bf16.msra.mxu0 %v804_v33 }
  0xe7   : > { %v725_v35 = vpop.f32.mrb[0].mxu0 }
  0xe8   : > { %v344_v36 = vadd.f32 %v725_v35, %v671_v34  ;;  %v335_v37 = vpop.f32.mrb[1].mxu0 }
  0xe9   : > { %v336_v38 = vadd.f32 %v671_v34, %v335_v37  ;;  %v726_v39 = vpop.f32.mrb[2].mxu0 }
  0xea   : > { %v347_v40 = vadd.f32 %v726_v39, %v671_v34  ;;  %v338_v41 = vpop.f32.mrb[3].mxu0  ;;  %v400_v43 = vmax.f32 %v344_v36, 0.0 }
  0xeb   : > { %v339_v42 = vadd.f32 %v671_v34, %v338_v41  ;;  %v398_v45 = vmax.f32 %v336_v38, 0.0 }
  0xec   : > { %v401_v44 = vmax.f32 %v347_v40, 0.0 }
  0xed   : > { %v399_v46 = vmax.f32 %v339_v42, 0.0 }
  0xee   : > { %v415_v47 = vpack.c.bf16 %v401_v44, %v400_v43 }
  0xef   : > { %v414_v48 = vpack.c.bf16 %v399_v46, %v398_v45  ;;  %v729_v49 = vpop.f32.mrb[4].mxu0 }
  0xf0   : > { %v360_v50 = vadd.f32 %v729_v49, %v671_v34  ;;  %v351_v51 = vpop.f32.mrb[5].mxu0 }
  0xf1   : > { %v352_v52 = vadd.f32 %v671_v34, %v351_v51  ;;  %v730_v53 = vpop.f32.mrb[6].mxu0  ;;  %755 = vmatprep.mubr.bf16.mxu0 %v414_v48 }
  0xf2   : > { %v363_v54 = vadd.f32 %v730_v53, %v671_v34  ;;  %v354_v55 = vpop.f32.mrb[7].mxu0  ;;  %756 = vmatmul.mubr.bf16.vlgmr.msra.gmra.mrb[16].mxu0 %v415_v47  ;;  %v404_v57 = vmax.f32 %v360_v50, 0.0 }
  0xf3   : > { %v355_v56 = vadd.f32 %v671_v34, %v354_v55  ;;  %v402_v59 = vmax.f32 %v352_v52, 0.0 }
  0xf4   : > { %v405_v58 = vmax.f32 %v363_v54, 0.0 }
  0xf5   : > { %v403_v60 = vmax.f32 %v355_v56, 0.0 }
  0xf6   : > { %v417_v61 = vpack.c.bf16 %v405_v58, %v404_v57 }
  0xf7   : > { %v733_v62 = vpop.f32.mrb[8].mxu0  ;;  %v416_v63 = vpack.c.bf16 %v403_v60, %v402_v59 }
  0xf8   : > { %v376_v0 = vadd.f32 %v733_v62, %v671_v34  ;;  %v367_v1 = vpop.f32.mrb[9].mxu0 }
  0xf9   : > { %v368_v2 = vadd.f32 %v671_v34, %v367_v1  ;;  %v734_v3 = vpop.f32.mrb[10].mxu0  ;;  %759 = vmatprep.mubr.bf16.mxu1 %v416_v63 }
  0xfa   : > { %v379_v4 = vadd.f32 %v734_v3, %v671_v34  ;;  %v370_v5 = vpop.f32.mrb[11].mxu0  ;;  %760 = vmatmul.mubr.bf16.vlgmr.msra.gmra.mrb[0].mxu1 %v417_v61  ;;  %v408_v7 = vmax.f32 %v376_v0, 0.0 }
  0xfb   : > { %v371_v6 = vadd.f32 %v671_v34, %v370_v5  ;;  %v406_v9 = vmax.f32 %v368_v2, 0.0 }
  0xfc   : > { %v409_v8 = vmax.f32 %v379_v4, 0.0 }
  0xfd   : > { %v407_v10 = vmax.f32 %v371_v6, 0.0 }
  0xfe   : > { %v419_v11 = vpack.c.bf16 %v409_v8, %v408_v7 }
  0xff   : > { %v418_v12 = vpack.c.bf16 %v407_v10, %v406_v9  ;;  %v737_v13 = vpop.f32.mrb[12].mxu0 }
 0x100   : > { %v392_v14 = vadd.f32 %v737_v13, %v671_v34  ;;  %v383_v15 = vpop.f32.mrb[13].mxu0 }
 0x101   : > { %v384_v16 = vadd.f32 %v671_v34, %v383_v15  ;;  %v738_v17 = vpop.f32.mrb[14].mxu0  ;;  %763 = vmatprep.mubr.bf16.mxu1 %v418_v12 }
 0x102   : > { %v395_v18 = vadd.f32 %v738_v17, %v671_v34  ;;  %v386_v19 = vpop.f32.mrb[15].mxu0  ;;  %764 = vmatmul.mubr.bf16.gmra.mrb[4].mxu1 %v419_v11  ;;  %v412_v21 = vmax.f32 %v392_v14, 0.0 }
 0x103   : > { %v387_v20 = vadd.f32 %v671_v34, %v386_v19  ;;  %v410_v23 = vmax.f32 %v384_v16, 0.0 }
 0x104   : > { %v413_v22 = vmax.f32 %v395_v18, 0.0 }
 0x105   : > { %v411_v24 = vmax.f32 %v387_v20, 0.0 }
 0x106   : > { %v421_v25 = vpack.c.bf16 %v413_v22, %v412_v21 }
 0x107   : > { %v420_v26 = vpack.c.bf16 %v411_v24, %v410_v23 }
 0x109   : > { %767 = vmatprep.mubr.bf16.mxu1 %v420_v26 }
 0x10a   : > { %768 = vmatmul.mubr.bf16.gmra.mrb[8].mxu1 %v421_v25 }
 0x1c5   : > { %v757_v28 = vpop.f32.mrb[16].mxu0 }
 0x1c6   : > { %v536_v29 = vadd.f32 %v757_v28, %v682_v27  ;;  %v527_v30 = vpop.f32.mrb[17].mxu0 }
 0x1c7   : > { %v528_v31 = vadd.f32 %v682_v27, %v527_v30  ;;  %v758_v32 = vpop.f32.mrb[18].mxu0 }
 0x1c8   : > { %592 = vst.msk [vmem:[%s926_s28 + $0x10] sm:$0xff] %vm276_vm0, %v536_v29  ;;  %v539_v33 = vadd.f32 %v758_v32, %v682_v27  ;;  %v530_v34 = vpop.f32.mrb[19].mxu0 }
 0x1c9   : > { %590 = vst.msk [vmem:[%s926_s28] sm:$0xff] %vm276_vm0, %v528_v31  ;;  %v531_v35 = vadd.f32 %v682_v27, %v530_v34 }
 0x1ca   : > { %593 = vst.msk [vmem:[%s926_s28 + $0x18] sm:$0xff] %vm276_vm0, %v539_v33 }
 0x1cb   : > { %591 = vst.msk [vmem:[%s926_s28 + $0x8] sm:$0xff] %vm276_vm0, %v531_v35 }
 0x1cd   : > { %v761_v36 = vpop.f32.mrb[0].mxu1 }
 0x1ce   : > { %v552_v37 = vadd.f32 %v761_v36, %v682_v27  ;;  %v543_v38 = vpop.f32.mrb[1].mxu1 }
 0x1cf   : > { %v544_v39 = vadd.f32 %v682_v27, %v543_v38  ;;  %v762_v40 = vpop.f32.mrb[2].mxu1 }
 0x1d0   : > { %596 = vst.msk [vmem:[%s926_s28 + $0x30] sm:$0xff] %vm276_vm0, %v552_v37  ;;  %v555_v41 = vadd.f32 %v762_v40, %v682_v27  ;;  %v546_v42 = vpop.f32.mrb[3].mxu1 }
 0x1d1   : > { %594 = vst.msk [vmem:[%s926_s28 + $0x20] sm:$0xff] %vm276_vm0, %v544_v39  ;;  %v547_v43 = vadd.f32 %v682_v27, %v546_v42 }
 0x1d2   : > { %597 = vst.msk [vmem:[%s926_s28 + $0x38] sm:$0xff] %vm276_vm0, %v555_v41 }
 0x1d3   : > { %595 = vst.msk [vmem:[%s926_s28 + $0x28] sm:$0xff] %vm276_vm0, %v547_v43 }
 0x1d5   : > { %v765_v44 = vpop.f32.mrb[4].mxu1 }
 0x1d6   : > { %v568_v45 = vadd.f32 %v765_v44, %v682_v27  ;;  %v559_v46 = vpop.f32.mrb[5].mxu1 }
 0x1d7   : > { %v560_v47 = vadd.f32 %v682_v27, %v559_v46  ;;  %v766_v48 = vpop.f32.mrb[6].mxu1 }
 0x1d8   : > { %600 = vst.msk [vmem:[%s926_s28 + $0x50] sm:$0xff] %vm276_vm0, %v568_v45  ;;  %v571_v49 = vadd.f32 %v766_v48, %v682_v27  ;;  %v562_v50 = vpop.f32.mrb[7].mxu1 }
 0x1d9   : > { %598 = vst.msk [vmem:[%s926_s28 + $0x40] sm:$0xff] %vm276_vm0, %v560_v47  ;;  %v563_v51 = vadd.f32 %v682_v27, %v562_v50 }
 0x1da   : > { %601 = vst.msk [vmem:[%s926_s28 + $0x58] sm:$0xff] %vm276_vm0, %v571_v49 }
 0x1db   : > { %599 = vst.msk [vmem:[%s926_s28 + $0x48] sm:$0xff] %vm276_vm0, %v563_v51 }
 0x1dd   : > { %v769_v52 = vpop.f32.mrb[8].mxu1 }
 0x1de   : > { %v584_v53 = vadd.f32 %v769_v52, %v682_v27  ;;  %v575_v54 = vpop.f32.mrb[9].mxu1 }
 0x1df   : > { %v576_v55 = vadd.f32 %v682_v27, %v575_v54  ;;  %v770_v56 = vpop.f32.mrb[10].mxu1 }
 0x1e0   : > { %604 = vst.msk [vmem:[%s926_s28 + $0x70] sm:$0xff] %vm276_vm0, %v584_v53  ;;  %v587_v57 = vadd.f32 %v770_v56, %v682_v27  ;;  %v578_v58 = vpop.f32.mrb[11].mxu1 }
 0x1e1   : > { %602 = vst.msk [vmem:[%s926_s28 + $0x60] sm:$0xff] %vm276_vm0, %v576_v55  ;;  %v579_v59 = vadd.f32 %v682_v27, %v578_v58 }
 0x1e2   : > { %605 = vst.msk [vmem:[%s926_s28 + $0x78] sm:$0xff] %vm276_vm0, %v587_v57 }
 0x1e3   : > { %603 = vst.msk [vmem:[%s926_s28 + $0x68] sm:$0xff] %vm276_vm0, %v579_v59 }
 0x1e4 PF: > { %s15_s18 = sadd.s32 1, %s811_s18  }
 0x1e5   : > { %p12_p4 = scmp.ge.s32.totalorder %s15_s18, 4  }
 0x1e7   :  { %14 = sbr.rel (!%p12_p4) target bundleno = 1 (0x1), region = 70 }

</bundles_post_ra>
